<compile_context>
chip_gen: v6e
topology: v6e:2x2x1
jax: 0.10.0
libtpu: 0.0.40
codegen_flags: <defaults>
</compile_context>

<pallas_src>
import jax
import jax.numpy as jnp
from jax.experimental import pallas as pl
from jax.experimental.pallas import tpu as pltpu


def _act_kernel(x_ref, o_ref):
    x = x_ref[...]
    # Sub-32-bit inputs (e.g. bf16): widen once per tile; v5e has no bf16 VALU
    # path so this avoids implicit pack/unpack churn. No-op for f32.
    if x.dtype.itemsize < 4:
        x = x.astype(jnp.float32)
    r = jnp.maximum(x, jnp.zeros_like(x))
    # relu(x) ** 3 as two VPU multiplies (do NOT use jnp.power / EUP).
    o_ref[...] = (r * r * r).astype(o_ref.dtype)


def act_op(x):
    """Pallas TPU implementation of F.relu(x) ** 3 for arbitrary-shaped x."""
    orig_shape = x.shape
    orig_dtype = x.dtype
    n = x.size
    if n == 0:
        # Nothing to compute for empty inputs.
        return x

    LANE = 1024          # lane-dense width: large multiple of 128
    MAX_TILE_ROWS = 512  # 512 x 1024 f32 = 2 MiB per tile

    flat = x.reshape(-1)

    rows = pl.cdiv(n, LANE)
    # Tile rows: multiple of 8 (sublane), capped at MAX_TILE_ROWS.
    tile_r = min(MAX_TILE_ROWS, ((rows + 7) // 8) * 8)
    # Pad the flat slab so every tile is full -> no masked remainder stores.
    padded_rows = ((rows + tile_r - 1) // tile_r) * tile_r
    padded_n = padded_rows * LANE
    if padded_n != n:
        flat = jnp.pad(flat, (0, padded_n - n))
    x2d = flat.reshape(padded_rows, LANE)

    grid = (padded_rows // tile_r,)

    out = pl.pallas_call(
        _act_kernel,
        out_shape=jax.ShapeDtypeStruct((padded_rows, LANE), orig_dtype),
        grid=grid,
        in_specs=[pl.BlockSpec((tile_r, LANE), lambda i: (i, 0))],
        out_specs=pl.BlockSpec((tile_r, LANE), lambda i: (i, 0)),
        compiler_params=pltpu.CompilerParams(
            dimension_semantics=("parallel",),
        ),
    )(x2d)

    out_flat = out.reshape(-1)
    if padded_n != n:
        out_flat = out_flat[:n]
    return out_flat.reshape(orig_shape)


if __name__ == "__main__":
    key = jax.random.PRNGKey(0)
    # NCHW input, small shapes: batch=2, channels=4, spatial=16x16
    x = jax.random.normal(key, (2, 4, 16, 16), dtype=jnp.float32)

    y = act_op(x)
    jax.block_until_ready(y)

    # sanity check vs pure-JAX reference
    ref = jnp.maximum(x, 0.0) ** 3
    assert y.shape == x.shape and y.dtype == x.dtype
    assert jnp.allclose(y, ref, atol=1e-6, rtol=1e-6)

    print("KERNEL_OK")
</pallas_src>

<mosaic_0001>
module attributes {stable_mosaic.version = 11 : i64} {
  func.func @_act_kernel(%arg0: i32, %arg1: memref<8x1024xf32, #tpu.memory_space<vmem>>, %arg2: memref<8x1024xf32, #tpu.memory_space<vmem>>) attributes {dimension_semantics = [#tpu.dimension_semantics<parallel>], iteration_bounds = array<i64: 1>, scalar_prefetch = 0 : i64, scratch_operands = 0 : i64, tpu.core_type = #tpu.core_type<tc>, window_params = [{transform_indices = @transform_0, window_bounds = array<i64: 8, 1024>}, {transform_indices = @transform_1, window_bounds = array<i64: 8, 1024>}]} {
    %c0 = arith.constant 0 : index
    %c0_0 = arith.constant 0 : index
    %0 = vector.load %arg1[%c0, %c0_0] : memref<8x1024xf32, #tpu.memory_space<vmem>>, vector<8x1024xf32>
    %cst = arith.constant 0.000000e+00 : f32
    %1 = vector.broadcast %cst : f32 to vector<8x1024xf32>
    %2 = arith.maximumf %0, %1 : vector<8x1024xf32>
    %3 = arith.mulf %2, %2 : vector<8x1024xf32>
    %4 = arith.mulf %3, %2 : vector<8x1024xf32>
    %c0_1 = arith.constant 0 : index
    %c0_2 = arith.constant 0 : index
    %5 = vector.load %arg2[%c0_1, %c0_2] : memref<8x1024xf32, #tpu.memory_space<vmem>>, vector<8x1024xf32>
    tpu.vector_store %arg2[%c0_1, %c0_2], %4 {strides = array<i32>} : memref<8x1024xf32, #tpu.memory_space<vmem>>, vector<8x1024xf32>,
    return
  }
  func.func @transform_0(%arg0: i32) -> (i32, i32) {
    %c0_i32 = arith.constant 0 : i32
    %c0_i32_0 = arith.constant 0 : i32
    return %arg0, %c0_i32 : i32, i32
  }
  func.func @transform_1(%arg0: i32) -> (i32, i32) {
    %c0_i32 = arith.constant 0 : i32
    %c0_i32_0 = arith.constant 0 : i32
    return %arg0, %c0_i32 : i32, i32
  }
}

</mosaic_0001>

<bundles_post_ra>
// kernel: tpu_custom_call.1
= control target key start
LH: loop header
LB: loop body
LE: loop exit
PB: predicated region body
PF: predicated region fallthrough
CT: control target
= control target key end

     0   :  { %6 = vsyncpa [#allocation3], 0  ;;  %s140_s0 = inlined_call_operand.hbm [shape: f32[8,1024], index: 0, kind: input, shape index: {}]   ;;  %s141_s1 = inlined_call_operand.hbm [shape: f32[8,1024], index: 1, kind: output, shape index: {}]  }
   0x1   :  { %7 = vsyncpa [#allocation4], 0  ;;  %s122_s6 = smov [#allocation2]  }
   0x2   :  { %s14_s7 = sshll.u32 %s122_s6, 4  ;;  %s15_s7 = int_to_ptr.vmem [resolvable:$true] %s14_s7 }
   0x3   :  { %s86_s8 = scalar_lea.vmem %s15_s7, 1024  ;;  %p91_p1 = scmp.lt.s32.totalorder %s15_s7, %s15_s7 }
   0x4   :  { %p87_p0 = scmp.ne.s32.totalorder %s15_s7, %s86_s8  ;;  %p92_p2 = scmp.lt.s32.totalorder %s86_s8, %s86_s8 }
   0x6   :  { %p93_p3 = por %p92_p2, %p91_p1 }
   0x8   :  { %p94_p4 = pnand %p93_p3, %p87_p0 }
   0xa   :  { %97 = shalt.err (!%p94_p4)
}
   0xb   :  { %17 = dma.hbm_to_vmem [thread:$0]  %s140_s0, 1024, %s15_s7, [#allocation3]  }
   0xc   :  { %118 = dma.done.wait [#allocation3], 1024  }
   0xd   :  { %119 = vsyncadd [#allocation3], 4294966272  ;;  %v21_v0 = vld [vmem:[#allocation2] sm:$0xff]  ;;  %v22_v1 = vld [vmem:[#allocation2 + $0x8] sm:$0xff]  ;;  %s123_s0 = smov [#allocation5]  }
   0xe   :  { %v23_v2 = vld [vmem:[#allocation2 + $0x10] sm:$0xff]  ;;  %v29_v3 = vmax.f32 %v21_v0, 0.0  ;;  %v30_v4 = vmax.f32 %v22_v1, 0.0  ;;  %v24_v6 = vld [vmem:[#allocation2 + $0x18] sm:$0xff]  ;;  %v25_v7 = vld [vmem:[#allocation2 + $0x20] sm:$0xff]  ;;  %s67_s11 = sshll.u32 %s123_s0, 4  ;;  %s68_s11 = int_to_ptr.vmem [resolvable:$true] %s67_s11 }
   0xf   :  { %v31_v5 = vmax.f32 %v23_v2, 0.0  ;;  %v26_v8 = vld [vmem:[#allocation2 + $0x28] sm:$0xff]  ;;  %v32_v9 = vmax.f32 %v24_v6, 0.0  ;;  %v33_v10 = vmax.f32 %v25_v7, 0.0  ;;  %v27_v12 = vld [vmem:[#allocation2 + $0x30] sm:$0xff]  ;;  %v28_v13 = vld [vmem:[#allocation2 + $0x38] sm:$0xff]  ;;  %p103_p6 = scmp.lt.s32.totalorder %s68_s11, %s68_s11 }
  0x10   :  { %v34_v11 = vmax.f32 %v26_v8, 0.0  ;;  %v37_v14 = vmul.f32 %v29_v3, %v29_v3  ;;  %v38_v15 = vmul.f32 %v30_v4, %v30_v4  ;;  %v35_v17 = vmax.f32 %v27_v12, 0.0  ;;  %s98_s12 = scalar_lea.vmem %s68_s11, 1024 }
  0x11   :  { %v39_v16 = vmul.f32 %v31_v5, %v31_v5  ;;  %v40_v18 = vmul.f32 %v32_v9, %v32_v9  ;;  %v41_v19 = vmul.f32 %v33_v10, %v33_v10  ;;  %v36_v21 = vmax.f32 %v28_v13, 0.0  ;;  %p99_p5 = scmp.ne.s32.totalorder %s68_s11, %s98_s12  ;;  %p104_p7 = scmp.lt.s32.totalorder %s98_s12, %s98_s12 }
  0x12   :  { %v42_v20 = vmul.f32 %v34_v11, %v34_v11  ;;  %v45_v22 = vmul.f32 %v37_v14, %v29_v3  ;;  %v46_v23 = vmul.f32 %v38_v15, %v30_v4  ;;  %v43_v25 = vmul.f32 %v35_v17, %v35_v17 }
  0x13   :  { %v47_v24 = vmul.f32 %v39_v16, %v31_v5  ;;  %v48_v26 = vmul.f32 %v40_v18, %v32_v9  ;;  %v49_v27 = vmul.f32 %v41_v19, %v33_v10  ;;  %v44_v29 = vmul.f32 %v36_v21, %v36_v21  ;;  %p105_p8 = por %p104_p7, %p103_p6 }
  0x14   :  { %v50_v28 = vmul.f32 %v42_v20, %v34_v11  ;;  %53 = vst [vmem:[#allocation5] sm:$0xff] %v45_v22  ;;  %54 = vst [vmem:[#allocation5 + $0x8] sm:$0xff] %v46_v23  ;;  %v51_v30 = vmul.f32 %v43_v25, %v35_v17 }
  0x15   :  { %55 = vst [vmem:[#allocation5 + $0x10] sm:$0xff] %v47_v24  ;;  %56 = vst [vmem:[#allocation5 + $0x18] sm:$0xff] %v48_v26  ;;  %v52_v31 = vmul.f32 %v44_v29, %v36_v21  ;;  %p106_p9 = pnand %p105_p8, %p99_p5 }
  0x16   :  { %57 = vst [vmem:[#allocation5 + $0x20] sm:$0xff] %v49_v27  ;;  %58 = vst [vmem:[#allocation5 + $0x28] sm:$0xff] %v50_v28 }
  0x17   :  { %59 = vst [vmem:[#allocation5 + $0x30] sm:$0xff] %v51_v30  ;;  %60 = vst [vmem:[#allocation5 + $0x38] sm:$0xff] %v52_v31 }
  0x18   :  { %109 = shalt.err (!%p106_p9)
}
  0x19   :  { %70 = dma.vmem_to_hbm [thread:$0]  %s68_s11, 1024, %s141_s1, [#allocation4]  }
  0x1a   :  { %120 = dma.done.wait [#allocation4], 1024  }
  0x1b   :  { %121 = vsyncadd [#allocation4], 4294966272 }
  0x1c   :  { %74 = vsyncpa [#allocation3], 1 }
  0x1d   :  { %75 = vsyncpa [#allocation4], 1 }

</bundles_post_ra>
